<compile_context>
chip_gen: v7x
topology: tpu7x:2x2x1
jax: 0.10.0
libtpu: 0.0.40
codegen_flags: <defaults>
</compile_context>

<pallas_src>
import functools

import jax
import jax.numpy as jnp
import numpy as np
from jax.experimental import pallas as pl
from jax.experimental.pallas import tpu as pltpu


def _round_up(v, m):
    return ((v + m - 1) // m) * m


def _awx_norm_kernel(x_ref, rt_ref, o_ref, sig_ref, *, n, epsilon):
    """n >= 1 branch: out = finalize( dot(sigmoid(x)^n, (R^n).T) ).

    sigmoid(x)^n is computed once per x tile (class-tile index j == 0) and
    cached in a VMEM scratch that persists across the 'arbitrary' j axis.
    """
    @pl.when(pl.program_id(1) == 0)
    def _():
        sig = jax.nn.sigmoid(x_ref[...].astype(jnp.float32))
        if n > 1:
            sig = sig ** n
        sig_ref[...] = sig.astype(sig_ref.dtype)

    # (tb, L) @ (L, tc) -> (tb, tc) on the MXU, f32 accumulation.
    s = jnp.dot(sig_ref[...], rt_ref[...], preferred_element_type=jnp.float32)
    if n > 1:
        s = jnp.clip(s, epsilon, 1.0 - epsilon) ** (1.0 / n)
    else:
        s = jnp.minimum(s, 1.0 - 1e-4)
    o_ref[...] = s.astype(o_ref.dtype)


def _awx_max_kernel(x_ref, rt_ref, o_ref, sig_ref, *, lk):
    """n <= 0 branch: out[b, c] = max_l sigmoid(x)[b, l] * R[c, l].

    Chunked running max over L; only (tb, lk, tc) lives at once (no
    (tb, tc, L) materialization). VPU/XLU path, no matmul form exists.
    """
    @pl.when(pl.program_id(1) == 0)
    def _():
        sig_ref[...] = jax.nn.sigmoid(x_ref[...].astype(jnp.float32))

    sig = sig_ref[...]                                        # (tb, L)
    rt = rt_ref[...]                                          # (L, tc)
    tb, L = sig.shape
    tc = rt.shape[1]

    acc = jnp.full((tb, tc), -jnp.inf, dtype=jnp.float32)
    for c0 in range(0, L, lk):                                # static loop/slices
        cw = min(lk, L - c0)
        s_chunk = sig[:, c0:c0 + cw]                          # (tb, cw)
        r_chunk = rt[c0:c0 + cw, :]                           # (cw, tc)
        prod = s_chunk[:, :, None] * r_chunk[None, :, :]      # (tb, cw, tc)
        acc = jnp.maximum(acc, jnp.max(prod, axis=1))
    o_ref[...] = acc.astype(o_ref.dtype)


def awx_forward(x, R, *, n, epsilon=1e-6, tb=128, tc=256,
                matmul_dtype=jnp.float32):
    """AWX forward. x: (B, L) leaf logits, R: (C, L) hierarchy matrix -> (B, C)."""
    B, L = x.shape
    C, L2 = R.shape
    assert L == L2, "R must have shape (num_classes, num_leaves)"

    if n <= 0:
        # Max branch uses a (tb, lk, tc) broadcast per chunk; keep the batch
        # tile small so it stays within the vreg file.
        tb = min(tb, 8)

    # (8, 128)-aligned tiles, clipped to the (padded) problem size.
    tb = max(8, min(_round_up(tb, 8), _round_up(B, 8)))
    tc = max(128, min(_round_up(tc, 128), _round_up(C, 128)))
    B_pad = _round_up(B, tb)
    C_pad = _round_up(C, tc)

    # Precompute (R ** n).T once, outside the hot loop: (L, C_pad). This is
    # the MXU's preferred (K, N) RHS layout with the class dim on lanes.
    rt = R.astype(jnp.float32).T                              # (L, C)
    if n > 1:
        rt = rt ** n
    if C_pad != C:
        rt = jnp.pad(rt, ((0, 0), (0, C_pad - C)))
    rt_dtype = matmul_dtype if n > 0 else jnp.float32
    rt = rt.astype(rt_dtype)

    xp = x if B_pad == B else jnp.pad(x, ((0, B_pad - B), (0, 0)))

    if n > 0:
        kernel = functools.partial(_awx_norm_kernel, n=n, epsilon=epsilon)
        scratch_dtype = matmul_dtype
    else:
        kernel = functools.partial(_awx_max_kernel, lk=8)
        scratch_dtype = jnp.float32

    sc_item = jnp.dtype(scratch_dtype).itemsize
    rt_item = jnp.dtype(rt_dtype).itemsize
    vmem_need = (2 * tb * L * 4          # double-buffered x tiles
                 + 2 * L * tc * rt_item  # double-buffered (R**n).T tiles
                 + 2 * tb * tc * 4       # double-buffered output tiles
                 + tb * L * sc_item      # sigmoid scratch
                 + (4 << 20))            # headroom
    vmem_limit = int(min(max(vmem_need, 32 << 20), 100 << 20))

    out = pl.pallas_call(
        kernel,
        out_shape=jax.ShapeDtypeStruct((B_pad, C_pad), jnp.float32),
        grid_spec=pltpu.PrefetchScalarGridSpec(
            num_scalar_prefetch=0,
            grid=(B_pad // tb, C_pad // tc),
            in_specs=[
                pl.BlockSpec((tb, L), lambda i, j: (i, 0)),   # x: constant in j
                pl.BlockSpec((L, tc), lambda i, j: (0, j)),   # (R**n).T tile
            ],
            out_specs=pl.BlockSpec((tb, tc), lambda i, j: (i, j)),
            scratch_shapes=[pltpu.VMEM((tb, L), scratch_dtype)],
        ),
        compiler_params=pltpu.CompilerParams(
            # j is 'arbitrary' so the sigmoid scratch legally carries across it;
            # i stays 'parallel' for megacore sharding (v7x: 2 TCs/chip).
            dimension_semantics=("parallel", "arbitrary"),
            vmem_limit_bytes=vmem_limit,
        ),
    )(xp, rt)

    return out[:B, :C]


def awx_reference(x, R, *, n, epsilon=1e-6):
    """Pure-JAX reference matching the PyTorch semantics."""
    sig = jax.nn.sigmoid(x)                                   # (B, L)
    prod = sig[:, None, :] * R[None, :, :]                    # (B, C, L)
    if n > 1:
        s = jnp.sum(prod ** n, axis=-1)
        return jnp.clip(s, epsilon, 1.0 - epsilon) ** (1.0 / n)
    elif n > 0:
        return jnp.minimum(jnp.sum(prod, axis=-1), 1.0 - 1e-4)
    else:
        return jnp.max(prod, axis=-1)


if __name__ == "__main__":
    # Small, deterministic synthetic setup.
    B, L, C = 8, 128, 256   # batch, leaf classes, total hierarchy classes

    key = jax.random.PRNGKey(0)
    kx, kr = jax.random.split(key)

    # Leaf-level logits from the upstream classifier.
    x = jax.random.normal(kx, (B, L), dtype=jnp.float32)

    # Synthetic ancestry matrix R (hierarchy.R.T): binary, shape (C, L).
    R = jax.random.bernoulli(kr, p=0.1, shape=(C, L)).astype(jnp.float32)

    # Exercise all three branches of the module: n > 1 (MXU n-norm path),
    # n == 1 (plain sum), n <= 0 (running max).
    for norm in (5, 1, 0):
        out = jax.block_until_ready(awx_forward(x, R, n=norm))
        ref = awx_reference(x, R, n=norm)
        np.testing.assert_allclose(np.asarray(out), np.asarray(ref),
                                   rtol=1e-3, atol=1e-5)

    print("KERNEL_OK")
</pallas_src>

<mosaic_0001>
module attributes {stable_mosaic.version = 11 : i64} {
  func.func @_awx_norm_kernel(%arg0: i32, %arg1: i32, %arg2: memref<8x128xf32, #tpu.memory_space<vmem>>, %arg3: memref<128x256xf32, #tpu.memory_space<vmem>>, %arg4: memref<8x256xf32, #tpu.memory_space<vmem>>, %arg5: memref<8x128xf32, #tpu.memory_space<vmem>>) attributes {dimension_semantics = [#tpu.dimension_semantics<parallel>, #tpu.dimension_semantics<arbitrary>], iteration_bounds = array<i64: 1, 1>, scalar_prefetch = 0 : i64, scratch_operands = 1 : i64, tpu.core_type = #tpu.core_type<tc>, window_params = [{transform_indices = @transform_0, window_bounds = array<i64: 8, 128>}, {transform_indices = @transform_1, window_bounds = array<i64: 128, 256>}, {transform_indices = @transform_2, window_bounds = array<i64: 8, 256>}]} {
    %c0_i32 = arith.constant 0 : i32
    %0 = arith.cmpi eq, %arg1, %c0_i32 : i32
    %1 = arith.extui %0 : i1 to i32
    %c0_i32_0 = arith.constant 0 : i32
    %2 = arith.cmpi ne, %1, %c0_i32_0 : i32
    scf.if %2 {
      %c0_9 = arith.constant 0 : index
      %c0_10 = arith.constant 0 : index
      %13 = vector.load %arg2[%c0_9, %c0_10] : memref<8x128xf32, #tpu.memory_space<vmem>>, vector<8x128xf32>
      %14 = arith.negf %13 : vector<8x128xf32>
      %15 = math.exp %14 : vector<8x128xf32>
      %cst_11 = arith.constant 1.000000e+00 : f32
      %16 = vector.broadcast %cst_11 : f32 to vector<8x128xf32>
      %17 = arith.addf %16, %15 : vector<8x128xf32>
      %18 = arith.divf %16, %17 : vector<8x128xf32>
      %19 = arith.mulf %18, %18 : vector<8x128xf32>
      %20 = arith.mulf %19, %19 : vector<8x128xf32>
      %21 = arith.mulf %18, %20 : vector<8x128xf32>
      %c0_12 = arith.constant 0 : index
      %c0_13 = arith.constant 0 : index
      %22 = vector.load %arg5[%c0_12, %c0_13] : memref<8x128xf32, #tpu.memory_space<vmem>>, vector<8x128xf32>
      tpu.vector_store %arg5[%c0_12, %c0_13], %21 {strides = array<i32>} : memref<8x128xf32, #tpu.memory_space<vmem>>, vector<8x128xf32>,
    } else {
    }
    %c0 = arith.constant 0 : index
    %c0_1 = arith.constant 0 : index
    %3 = vector.load %arg5[%c0, %c0_1] : memref<8x128xf32, #tpu.memory_space<vmem>>, vector<8x128xf32>
    %c0_2 = arith.constant 0 : index
    %c0_3 = arith.constant 0 : index
    %4 = vector.load %arg3[%c0_2, %c0_3] : memref<128x256xf32, #tpu.memory_space<vmem>>, vector<128x256xf32>
    %cst = arith.constant dense<0.000000e+00> : vector<8x256xf32>
    %5 = tpu.matmul %3, %4, %cst {dimension_numbers = #tpu.dot_dimension_numbers<[1], [0], [0], [1], [0, 0, 1, 1], [], []>} : vector<8x128xf32>, vector<128x256xf32>, vector<8x256xf32> -> vector<8x256xf32>
    %cst_4 = arith.constant 9.99999997E-7 : f32
    %cst_5 = arith.constant 0.999998986 : f32
    %6 = vector.broadcast %cst_4 : f32 to vector<8x256xf32>
    %7 = arith.maximumf %6, %5 : vector<8x256xf32>
    %8 = vector.broadcast %cst_5 : f32 to vector<8x256xf32>
    %9 = arith.minimumf %8, %7 : vector<8x256xf32>
    %cst_6 = arith.constant 2.000000e-01 : f32
    %10 = vector.broadcast %cst_6 : f32 to vector<8x256xf32>
    %11 = math.powf %9, %10 : vector<8x256xf32>
    %c0_7 = arith.constant 0 : index
    %c0_8 = arith.constant 0 : index
    %12 = vector.load %arg4[%c0_7, %c0_8] : memref<8x256xf32, #tpu.memory_space<vmem>>, vector<8x256xf32>
    tpu.vector_store %arg4[%c0_7, %c0_8], %11 {strides = array<i32>} : memref<8x256xf32, #tpu.memory_space<vmem>>, vector<8x256xf32>,
    return
  }
  func.func @transform_0(%arg0: i32, %arg1: i32) -> (i32, i32) {
    %c0_i32 = arith.constant 0 : i32
    %c0_i32_0 = arith.constant 0 : i32
    return %arg0, %c0_i32 : i32, i32
  }
  func.func @transform_1(%arg0: i32, %arg1: i32) -> (i32, i32) {
    %c0_i32 = arith.constant 0 : i32
    %c0_i32_0 = arith.constant 0 : i32
    return %c0_i32, %arg1 : i32, i32
  }
  func.func @transform_2(%arg0: i32, %arg1: i32) -> (i32, i32) {
    %c0_i32 = arith.constant 0 : i32
    return %arg0, %arg1 : i32, i32
  }
}

</mosaic_0001>

<bundles_post_ra>
// kernel: tpu_custom_call.1
= control target key start
LH: loop header
LB: loop body
LE: loop exit
PB: predicated region body
PF: predicated region fallthrough
CT: control target
= control target key end

     0   :  { %7 = vsyncpa [#allocation4], 0  ;;  %s420_s0 = inlined_call_operand.hbm [shape: f32[8,128], index: 0, kind: input, shape index: {}]   ;;  %s421_s1 = inlined_call_operand.hbm [shape: f32[128,256], index: 1, kind: input, shape index: {}]   ;;  %s422_s2 = inlined_call_operand.hbm [shape: f32[8,256], index: 2, kind: output, shape index: {}]  }
   0x1   :  { %8 = vsyncpa [#allocation7], 0 }
   0x2   :  { %9 = vsyncpa [#allocation5], 0  ;;  %s356_s9 = smov [#allocation3]   ;;  %s357_s11 = smov [#allocation6]  }
   0x3   :  { %s16_s10 = sshll.u32 %s356_s9, 4  ;;  %s25_s12 = sshll.u32 %s357_s11, 4  ;;  %s17_s10 = int_to_ptr.vmem [resolvable:$true] %s16_s10  ;;  %s377_s12 = int_to_ptr.vmem [resolvable:$true] %s25_s12 }
   0x4   :  { %s284_s15 = scalar_lea.hbm %s420_s0, 128 }
   0x5   :  { %p285_p0 = scmp.ne.s32.totalorder %s420_s0, %s284_s15  ;;  %p288_p1 = scmp.lt.u32.totalorder %s284_s15, %s420_s0 }
   0x7   :  { %p290_p2 = pnand %p288_p1, %p285_p0 }
   0x9   :  { %293 = shalt.err (!%p290_p2)
}
   0xa   :  { %s294_s20 = scalar_lea.vmem %s17_s10, 128  ;;  %p299_p4 = scmp.lt.s32.totalorder %s17_s10, %s17_s10 }
   0xb   :  { %p295_p3 = scmp.ne.s32.totalorder %s17_s10, %s294_s20  ;;  %p300_p5 = scmp.lt.s32.totalorder %s294_s20, %s294_s20 }
   0xd   :  { %p301_p6 = por %p300_p5, %p299_p4 }
   0xf   :  { %p302_p7 = pnand %p301_p6, %p295_p3 }
  0x11   :  { %305 = shalt.err (!%p302_p7)
}
  0x12   :  { %19 = dma.hbm_to_vmem [thread:$0]  %s420_s0, 128, %s17_s10, [#allocation4]  }
  0x13   :  { %s306_s25 = scalar_lea.hbm %s421_s1, 4096 }
  0x14   :  { %p307_p8 = scmp.ne.s32.totalorder %s421_s1, %s306_s25  ;;  %p310_p9 = scmp.lt.u32.totalorder %s306_s25, %s421_s1 }
  0x16   :  { %p312_p10 = pnand %p310_p9, %p307_p8 }
  0x18   :  { %315 = shalt.err (!%p312_p10)
}
  0x19   :  { %s316_s30 = scalar_lea.vmem %s377_s12, 4096  ;;  %p321_p12 = scmp.lt.s32.totalorder %s377_s12, %s377_s12 }
  0x1a   :  { %p317_p11 = scmp.ne.s32.totalorder %s377_s12, %s316_s30  ;;  %p322_p13 = scmp.lt.s32.totalorder %s316_s30, %s316_s30 }
  0x1c   :  { %p323_p0 = por %p322_p13, %p321_p12 }
  0x1e   :  { %p324_p1 = pnand %p323_p0, %p317_p11 }
  0x20   :  { %327 = shalt.err (!%p324_p1)
}
  0x21   :  { %s358_s0 = smov 256   ;;  %s359_s3 = smov 16  }
  0x22   :  { %31 = dma.hbm_to_vmem [thread:$0]  %s421_s1, 4096, %s377_s12, [#allocation7], %s358_s0, %s358_s0, %s359_s3  }
  0x23   :  { %350 = dma.done.wait [#allocation4], 128  }
  0x24   :  { %351 = vsyncadd [#allocation4], 4294967168 }
  0x25   :  { %352 = dma.done.wait [#allocation7], 4096  }
  0x26   :  { %353 = vsyncadd [#allocation7], 4294963200  ;;  %v360_v0 = vmov 0.0   ;;  %v55_v1 = vld [vmem:[#allocation6 + $0x8] sm:$0xff]  ;;  %v57_v2 = vld [vmem:[#allocation6 + $0x18] sm:$0xff]  ;;  %s361_s1 = smov [#allocation8]  }
  0x27   :  { %150 = vmatprep.mubr.f32.mxu0 %v360_v0  ;;  %v54_v3 = vld [vmem:[#allocation6] sm:$0xff]  ;;  %v182_v4 = vpack.c.bf16 %v57_v2, %v55_v1  ;;  %v56_v5 = vld [vmem:[#allocation6 + $0x10] sm:$0xff]  ;;  %v59_v6 = vld [vmem:[#allocation6 + $0x28] sm:$0xff]  ;;  %s171_s6 = sshll.u32 %s361_s1, 4  ;;  %s172_s6 = int_to_ptr.vmem [resolvable:$true] %s171_s6 }
  0x28   :  { %v61_v7 = vld [vmem:[#allocation6 + $0x38] sm:$0xff]  ;;  %v184_v8 = vpack.c.bf16 %v56_v5, %v54_v3  ;;  %v58_v10 = vld [vmem:[#allocation6 + $0x20] sm:$0xff]  ;;  %v60_v11 = vld [vmem:[#allocation6 + $0x30] sm:$0xff]  ;;  %s328_s7 = scalar_lea.vmem %s172_s6, 256  ;;  %p333_p3 = scmp.lt.s32.totalorder %s172_s6, %s172_s6 }
  0x29   :  { %v186_v9 = vpack.c.bf16 %v61_v7, %v59_v6  ;;  %v63_v12 = vld [vmem:[#allocation6 + $0x48] sm:$0xff]  ;;  %183 = vmatprep.subr.bf16.mxu0 %v182_v4  ;;  %v65_v13 = vld [vmem:[#allocation6 + $0x58] sm:$0xff]  ;;  %v188_v14 = vpack.c.bf16 %v60_v11, %v58_v10  ;;  %v62_v16 = vld [vmem:[#allocation6 + $0x40] sm:$0xff]  ;;  %p329_p2 = scmp.ne.s32.totalorder %s172_s6, %s328_s7  ;;  %p334_p4 = scmp.lt.s32.totalorder %s328_s7, %s328_s7 }
  0x2a   :  { %185 = vmatpush1.bf16.msra.mxu0 %v184_v8  ;;  %v190_v15 = vpack.c.bf16 %v65_v13, %v63_v12  ;;  %v64_v17 = vld [vmem:[#allocation6 + $0x50] sm:$0xff]  ;;  %v67_v18 = vld [vmem:[#allocation6 + $0x68] sm:$0xff]  ;;  %v69_v19 = vld [vmem:[#allocation6 + $0x78] sm:$0xff] }
  0x2b   :  { %187 = vmatprep.subr.bf16.mxu0 %v186_v9  ;;  %v192_v20 = vpack.c.bf16 %v64_v17, %v62_v16  ;;  %v194_v21 = vpack.c.bf16 %v69_v19, %v67_v18  ;;  %v66_v22 = vld [vmem:[#allocation6 + $0x60] sm:$0xff]  ;;  %v68_v23 = vld [vmem:[#allocation6 + $0x70] sm:$0xff]  ;;  %v71_v24 = vld [vmem:[#allocation6 + $0x88] sm:$0xff]  ;;  %p335_p5 = por %p334_p4, %p333_p3 }
  0x2c   :  { %v73_v25 = vld [vmem:[#allocation6 + $0x98] sm:$0xff]  ;;  %v196_v28 = vpack.c.bf16 %v68_v23, %v66_v22  ;;  %v70_v30 = vld [vmem:[#allocation6 + $0x80] sm:$0xff]  ;;  %v72_v31 = vld [vmem:[#allocation6 + $0x90] sm:$0xff] }
  0x2d   :  { %v42_v26 = vld [vmem:[#allocation3] sm:$0xff]  ;;  %v198_v29 = vpack.c.bf16 %v73_v25, %v71_v24  ;;  %v75_v32 = vld [vmem:[#allocation6 + $0xa8] sm:$0xff]  ;;  %v200_v34 = vpack.c.bf16 %v72_v31, %v70_v30  ;;  %v74_v36 = vld [vmem:[#allocation6 + $0xa0] sm:$0xff]  ;;  %p336_p6 = pnand %p335_p5, %p329_p2 }
  0x2e   :  { %189 = vmatpush1.bf16.msra.mxu0 %v188_v14  ;;  %v181_v27 = vmul.f32 -1.442695, %v42_v26  ;;  %v77_v33 = vld [vmem:[#allocation6 + $0xb8] sm:$0xff]  ;;  %v76_v37 = vld [vmem:[#allocation6 + $0xb0] sm:$0xff]  ;;  %v79_v38 = vld [vmem:[#allocation6 + $0xc8] sm:$0xff] }
  0x2f   :  { %191 = vmatprep.subr.bf16.mxu0 %v190_v15  ;;  %v202_v35 = vpack.c.bf16 %v77_v33, %v75_v32  ;;  %v81_v39 = vld [vmem:[#allocation6 + $0xd8] sm:$0xff]  ;;  %v204_v40 = vpack.c.bf16 %v76_v37, %v74_v36  ;;  %v78_v42 = vld [vmem:[#allocation6 + $0xc0] sm:$0xff]  ;;  %v80_v43 = vld [vmem:[#allocation6 + $0xd0] sm:$0xff] }
  0x30   :  { %272 = vpow2.f32 %v181_v27  ;;  %v206_v41 = vpack.c.bf16 %v81_v39, %v79_v38  ;;  %v83_v44 = vld [vmem:[#allocation6 + $0xe8] sm:$0xff]  ;;  %v85_v45 = vld [vmem:[#allocation6 + $0xf8] sm:$0xff]  ;;  %v208_v47 = vpack.c.bf16 %v80_v43, %v78_v42  ;;  %v82_v50 = vld [vmem:[#allocation6 + $0xe0] sm:$0xff] }
  0x31   :  { %v210_v49 = vpack.c.bf16 %v85_v45, %v83_v44  ;;  %v84_v51 = vld [vmem:[#allocation6 + $0xf0] sm:$0xff] }
  0x32   :  { %193 = vmatpush1.bf16.msra.mxu0 %v192_v20  ;;  %v212_v52 = vpack.c.bf16 %v84_v51, %v82_v50 }
  0x33   :  { %195 = vmatprep.subr.bf16.mxu0 %v194_v21 }
  0x36   :  { %197 = vmatpush1.bf16.msra.mxu0 %v196_v28 }
  0x37   :  { %199 = vmatprep.subr.bf16.mxu0 %v198_v29 }
  0x3a   :  { %201 = vmatpush1.bf16.msra.mxu0 %v200_v34  ;;  %v273_v46 = vpop.eup %272 }
  0x3b   :  { %203 = vmatprep.subr.bf16.mxu0 %v202_v35  ;;  %v46_v48 = vadd.f32 1.0, %v273_v46 }
  0x3d   :  { %274 = vrcp.f32 %v46_v48 }
  0x3e   :  { %205 = vmatpush1.bf16.msra.mxu0 %v204_v40 }
  0x3f   :  { %207 = vmatprep.subr.bf16.mxu0 %v206_v41 }
  0x42   :  { %209 = vmatpush1.bf16.msra.mxu0 %v208_v47 }
  0x43   :  { %211 = vmatprep.subr.bf16.mxu0 %v210_v49 }
  0x46   :  { %213 = vmatpush1.bf16.msra.mxu0 %v212_v52 }
  0x47   :  { %v275_v53 = vpop.eup %274 }
  0x48   :  { %v49_v54 = vmul.f32 %v275_v53, %v275_v53 }
  0x4a   :  { %v50_v55 = vmul.f32 %v49_v54, %v49_v54 }
  0x4c   :  { %v51_v56 = vmul.f32 %v275_v53, %v50_v55 }
  0x4e   :  { %151 = vmatmul.mubr.f32.vlgmr.msra.gmra.mrb[0].mxu0 %v51_v56 }
 0x121   :  { %v152_v57 = vpop.f32.mrb[0].mxu0 }
 0x122   :  { %v157_v58 = vmax.f32 %v152_v57, 1e-06  ;;  %v154_v59 = vpop.f32.mrb[1].mxu0 }
 0x123   :  { %v158_v60 = vmax.f32 %v154_v59, 1e-06 }
 0x124   :  { %v159_v61 = vmin.f32 %v157_v58, 0.999999 }
 0x125   :  { %v160_v62 = vmin.f32 %v158_v60, 0.999999 }
 0x126   :  { %v218_v63 = vand.u32 2147483647, %v159_v61  ;;  %vm222_vm0 = vcmp.lt.f32.partialorder %v159_v61, 0  ;;  %vm223_vm1 = vcmp.eq.f32.partialorder %v159_v61, 0  ;;  %vm235_vm5 = vcmp.ne.f32.partialorder %v159_v61, %v159_v61 }
 0x127   :  { %v244_v0 = vand.u32 2147483647, %v160_v62  ;;  %vm248_vm2 = vcmp.lt.f32.partialorder %v160_v62, 0  ;;  %vm249_vm4 = vcmp.eq.f32.partialorder %v160_v62, 0  ;;  %vm224_vm7 = vcmp.eq.f32.partialorder %v159_v61, 1065353216 }
 0x128   :  { %276 = vlog2.f32 %v218_v63  ;;  %vm227_vm3 = vcmp.eq.f32.partialorder %v218_v63, 2139095040  ;;  %vm261_vm8 = vcmp.ne.f32.partialorder %v160_v62, %v160_v62  ;;  %vm250_vm9 = vcmp.eq.f32.partialorder %v160_v62, 1065353216 }
 0x129   :  { %278 = vlog2.f32 %v244_v0  ;;  %vm253_vm6 = vcmp.eq.f32.partialorder %v244_v0, 2139095040 }
 0x132   :  { %v277_v1 = vpop.eup %276 }
 0x133   :  { %v279_v2 = vpop.eup %278  ;;  %v220_v3 = vmul.f32 0.2, %v277_v1 }
 0x134   :  { %v246_v4 = vmul.f32 0.2, %v279_v2 }
 0x135   :  { %280 = vpow2.f32 %v220_v3 }
 0x136   :  { %282 = vpow2.f32 %v246_v4 }
 0x13f   :  { %v281_v5 = vpop.eup %280 }
 0x140   :  { %v283_v6 = vpop.eup %282  ;;  %v228_v7 = vsel %vm222_vm0, 2143289344, %v281_v5 }
 0x141   :  { %v229_v8 = vsel %vm223_vm1, 0, %v228_v7  ;;  %v254_v9 = vsel %vm248_vm2, 2143289344, %v283_v6 }
 0x142   :  { %v234_v10 = vsel %vm227_vm3, 2139095040, %v229_v8  ;;  %v255_v11 = vsel %vm249_vm4, 0, %v254_v9 }
 0x143   :  { %v238_v12 = vsel %vm235_vm5, 2143289344, %v234_v10  ;;  %v260_v13 = vsel %vm253_vm6, 2139095040, %v255_v11 }
 0x144   :  { %v239_v14 = vsel %vm224_vm7, 1065353216, %v238_v12  ;;  %v264_v15 = vsel %vm261_vm8, 2143289344, %v260_v13 }
 0x145   :  { %v265_v16 = vsel %vm250_vm9, 1065353216, %v264_v15  ;;  %163 = vst [vmem:[#allocation8] sm:$0xff] %v239_v14 }
 0x146   :  { %164 = vst [vmem:[#allocation8 + $0x8] sm:$0xff] %v265_v16 }
 0x147   :  { %339 = shalt.err (!%p336_p6)
}
 0x148   :  { %s340_s10 = scalar_lea.hbm %s422_s2, 256 }
 0x149   :  { %p341_p7 = scmp.ne.s32.totalorder %s422_s2, %s340_s10  ;;  %p344_p8 = scmp.lt.u32.totalorder %s340_s10, %s422_s2 }
 0x14b   :  { %p346_p9 = pnand %p344_p8, %p341_p7 }
 0x14d   :  { %349 = shalt.err (!%p346_p9)
}
 0x14e   :  { %174 = dma.vmem_to_hbm [thread:$0]  %s172_s6, 256, %s422_s2, [#allocation5]  }
 0x14f   :  { %354 = dma.done.wait [#allocation5], 256  }
 0x150   :  { %355 = vsyncadd [#allocation5], 4294967040 }
 0x151   :  { %178 = vsyncpa [#allocation4], 1 }
 0x152   :  { %179 = vsyncpa [#allocation7], 1 }
 0x153   :  { %180 = vsyncpa [#allocation5], 1 }

</bundles_post_ra>
